<compile_context>
chip_gen: v7x
topology: tpu7x:2x2x1
jax: 0.10.0
libtpu: 0.0.40
codegen_flags: <defaults>
</compile_context>

<pallas_src>
import functools

import jax
import jax.numpy as jnp
from jax.experimental import pallas as pl
from jax.experimental.pallas import tpu as pltpu

HIDDEN = 24
HIDDEN_PAD = 128   # hidden dim (24) padded to one full lane width
ACTION_PAD = 128   # action dim padded for lane-dense MXU compute (the store is narrow)
TB_CAP = 2048      # max batch-tile rows (fits v5e's 16 MiB scoped-VMEM default easily)


def _round_up(x, m):
    return ((x + m - 1) // m) * m


def dqn_kernel(x_ref, w1_ref, b1_ref, w2_ref, b2_ref, w3_ref, b3_ref, o_ref):
    """Fused fc1->ReLU->fc2->ReLU->output on one (TB, S) batch tile (all VMEM resident)."""
    x = x_ref[...]                                                          # (TB, S) bf16
    h1 = jnp.dot(x, w1_ref[...], preferred_element_type=jnp.float32) + b1_ref[...]
    h1 = jnp.maximum(h1, 0.0).astype(jnp.bfloat16)                          # (TB, 128)
    h2 = jnp.dot(h1, w2_ref[...], preferred_element_type=jnp.float32) + b2_ref[...]
    h2 = jnp.maximum(h2, 0.0).astype(jnp.bfloat16)                          # (TB, 128)
    out = jnp.dot(h2, w3_ref[...], preferred_element_type=jnp.float32) + b3_ref[...]
    # TODO(synk): for the B~8 RL serving loop, fuse argmax-over-actions here and return
    # an int32 action per row instead of Q-values (removes the writeback entirely).
    o_ref[...] = out[:, : o_ref.shape[1]].astype(o_ref.dtype)               # (TB, A) f32


@functools.partial(jax.jit, static_argnames=("action_size",))
def dq_network_forward(x, padded_params, action_size):
    """x: (B, state_size) float.  padded_params: lane-padded bf16 weights / f32 biases.
    Returns (B, action_size) float32, matching fc1->ReLU->fc2->ReLU->output."""
    B, S = x.shape
    p = padded_params

    # Pick the step count first, then size TB to it, so padding waste stays < 8*n_steps
    # rows instead of rounding B up to a fixed large tile.
    n_steps = -(-B // TB_CAP)
    if B >= 16:
        # v7x has 2 TensorCores: give the "parallel" batch axis >= 2 even steps so both
        # cores get equal work.  Near-free on single-TC v5e/v6e.
        if n_steps == 1:
            n_steps = 2
        elif n_steps % 2:
            n_steps += 1
    TB = _round_up(-(-B // n_steps), 8)
    B_pad = n_steps * TB

    x = x.astype(jnp.bfloat16)
    if B_pad != B:
        x = jnp.pad(x, ((0, B_pad - B), (0, 0)))

    # Cost estimate consistent with what the kernel actually computes / moves.
    flops = 2 * B_pad * (S * HIDDEN_PAD + HIDDEN_PAD * HIDDEN_PAD + HIDDEN_PAD * ACTION_PAD)
    bytes_accessed = (
        B_pad * S * 2                                                    # x (bf16)
        + (S * HIDDEN_PAD + HIDDEN_PAD * HIDDEN_PAD + HIDDEN_PAD * ACTION_PAD) * 2  # weights
        + (HIDDEN_PAD + HIDDEN_PAD + ACTION_PAD) * 4                     # biases (f32)
        + B_pad * action_size * 4                                        # narrow f32 out
    )

    out = pl.pallas_call(
        dqn_kernel,
        out_shape=jax.ShapeDtypeStruct((B_pad, action_size), jnp.float32),
        grid=(n_steps,),
        in_specs=[
            pl.BlockSpec((TB, S), lambda i: (i, 0)),                    # x: streamed
            pl.BlockSpec((S, HIDDEN_PAD), lambda i: (0, 0)),            # w1: resident
            pl.BlockSpec((1, HIDDEN_PAD), lambda i: (0, 0)),            # b1
            pl.BlockSpec((HIDDEN_PAD, HIDDEN_PAD), lambda i: (0, 0)),   # w2
            pl.BlockSpec((1, HIDDEN_PAD), lambda i: (0, 0)),            # b2
            pl.BlockSpec((HIDDEN_PAD, ACTION_PAD), lambda i: (0, 0)),   # w3
            pl.BlockSpec((1, ACTION_PAD), lambda i: (0, 0)),            # b3
        ],
        out_specs=pl.BlockSpec((TB, action_size), lambda i: (i, 0)),
        compiler_params=pltpu.CompilerParams(
            dimension_semantics=("parallel",),   # batch grid shards across v7x's 2 TCs
        ),
        cost_estimate=pl.CostEstimate(
            flops=flops, transcendentals=0, bytes_accessed=bytes_accessed
        ),
    )(x, p["w1"], p["b1"], p["w2"], p["b2"], p["w3"], p["b3"])

    return out[:B]


def init_params(key, state_size, action_size, hidden=HIDDEN):
    """Deterministic init mimicking PyTorch nn.Linear default (U[-1/sqrt(fan_in), +])."""
    keys = jax.random.split(key, 6)

    def linear(kw, kb, fan_in, fan_out):
        bound = 1.0 / jnp.sqrt(jnp.float32(fan_in))
        w = jax.random.uniform(kw, (fan_in, fan_out), jnp.float32, -bound, bound)
        b = jax.random.uniform(kb, (1, fan_out), jnp.float32, -bound, bound)
        return w, b

    w1, b1 = linear(keys[0], keys[1], state_size, hidden)
    w2, b2 = linear(keys[2], keys[3], hidden, hidden)
    w3, b3 = linear(keys[4], keys[5], hidden, action_size)
    return {"w1": w1, "b1": b1, "w2": w2, "b2": b2, "w3": w3, "b3": b3}


def pad_params(params, hidden_pad=HIDDEN_PAD, action_pad=ACTION_PAD):
    """Zero-pad hidden/output dims to lane widths and cast weights to bf16 (off hot path).
    Padded lanes stay exactly zero through bias + ReLU, so results are unchanged."""
    w1, b1 = params["w1"], params["b1"]
    w2, b2 = params["w2"], params["b2"]
    w3, b3 = params["w3"], params["b3"]
    h = w1.shape[1]
    a = w3.shape[1]
    return {
        "w1": jnp.pad(w1, ((0, 0), (0, hidden_pad - h))).astype(jnp.bfloat16),
        "b1": jnp.pad(b1, ((0, 0), (0, hidden_pad - h))),
        "w2": jnp.pad(w2, ((0, hidden_pad - h), (0, hidden_pad - h))).astype(jnp.bfloat16),
        "b2": jnp.pad(b2, ((0, 0), (0, hidden_pad - h))),
        "w3": jnp.pad(w3, ((0, hidden_pad - h), (0, action_pad - a))).astype(jnp.bfloat16),
        "b3": jnp.pad(b3, ((0, 0), (0, action_pad - a))),
    }


def dq_network_ref(x, p):
    """Pure f32 reference (original module semantics)."""
    h1 = jnp.maximum(x @ p["w1"] + p["b1"], 0.0)
    h2 = jnp.maximum(h1 @ p["w2"] + p["b2"], 0.0)
    return h2 @ p["w3"] + p["b3"]


def dq_network_ref_bf16(x, p):
    """Reference mimicking the kernel's bf16-operand / f32-accumulate arithmetic."""
    w1 = p["w1"].astype(jnp.bfloat16)
    w2 = p["w2"].astype(jnp.bfloat16)
    w3 = p["w3"].astype(jnp.bfloat16)
    xb = x.astype(jnp.bfloat16)
    h1 = jnp.maximum(
        jnp.dot(xb, w1, preferred_element_type=jnp.float32) + p["b1"], 0.0
    ).astype(jnp.bfloat16)
    h2 = jnp.maximum(
        jnp.dot(h1, w2, preferred_element_type=jnp.float32) + p["b2"], 0.0
    ).astype(jnp.bfloat16)
    return jnp.dot(h2, w3, preferred_element_type=jnp.float32) + p["b3"]


if __name__ == "__main__":
    key = jax.random.PRNGKey(0)
    k_params, k_x = jax.random.split(key)

    batch = 8
    state_size = 32
    action_size = 4

    params = init_params(k_params, state_size, action_size)
    padded = pad_params(params)
    x = jax.random.normal(k_x, (batch, state_size), dtype=jnp.float32)

    out = dq_network_forward(x, padded, action_size)
    out = jax.block_until_ready(out)

    ref_bf16 = dq_network_ref_bf16(x, params)   # same arithmetic as the kernel
    ref_f32 = dq_network_ref(x, params)         # original-module f32 semantics

    assert out.shape == (batch, action_size)
    assert jnp.allclose(out, ref_bf16, atol=1e-3, rtol=1e-3)
    assert jnp.allclose(out, ref_f32, atol=5e-2, rtol=5e-2)

    print("KERNEL_OK")
</pallas_src>

<mosaic_0001>
module attributes {stable_mosaic.version = 11 : i64} {
  func.func @dqn_kernel(%arg0: i32, %arg1: memref<8x32xbf16, #tpu.memory_space<vmem>>, %arg2: memref<32x128xbf16, #tpu.memory_space<vmem>>, %arg3: memref<1x128xf32, #tpu.memory_space<vmem>>, %arg4: memref<128x128xbf16, #tpu.memory_space<vmem>>, %arg5: memref<1x128xf32, #tpu.memory_space<vmem>>, %arg6: memref<128x128xbf16, #tpu.memory_space<vmem>>, %arg7: memref<1x128xf32, #tpu.memory_space<vmem>>, %arg8: memref<8x4xf32, #tpu.memory_space<vmem>>) attributes {dimension_semantics = [#tpu.dimension_semantics<parallel>], iteration_bounds = array<i64: 1>, scalar_prefetch = 0 : i64, scratch_operands = 0 : i64, tpu.core_type = #tpu.core_type<tc>, window_params = [{transform_indices = @transform_0, window_bounds = array<i64: 8, 32>}, {pipeline_mode = #tpu.pipeline_mode<synchronous>, transform_indices = @transform_1, window_bounds = array<i64: 32, 128>}, {pipeline_mode = #tpu.pipeline_mode<synchronous>, transform_indices = @transform_2, window_bounds = array<i64: 1, 128>}, {pipeline_mode = #tpu.pipeline_mode<synchronous>, transform_indices = @transform_3, window_bounds = array<i64: 128, 128>}, {pipeline_mode = #tpu.pipeline_mode<synchronous>, transform_indices = @transform_4, window_bounds = array<i64: 1, 128>}, {pipeline_mode = #tpu.pipeline_mode<synchronous>, transform_indices = @transform_5, window_bounds = array<i64: 128, 128>}, {pipeline_mode = #tpu.pipeline_mode<synchronous>, transform_indices = @transform_6, window_bounds = array<i64: 1, 128>}, {transform_indices = @transform_7, window_bounds = array<i64: 8, 4>}]} {
    %c0 = arith.constant 0 : index
    %c0_0 = arith.constant 0 : index
    %0 = vector.load %arg1[%c0, %c0_0] : memref<8x32xbf16, #tpu.memory_space<vmem>>, vector<8x32xbf16>
    %c0_1 = arith.constant 0 : index
    %c0_2 = arith.constant 0 : index
    %1 = vector.load %arg2[%c0_1, %c0_2] : memref<32x128xbf16, #tpu.memory_space<vmem>>, vector<32x128xbf16>
    %cst = arith.constant dense<0.000000e+00> : vector<8x128xf32>
    %2 = tpu.matmul %0, %1, %cst {dimension_numbers = #tpu.dot_dimension_numbers<[1], [0], [0], [1], [0, 0, 1, 1], [], []>} : vector<8x32xbf16>, vector<32x128xbf16>, vector<8x128xf32> -> vector<8x128xf32>
    %c0_3 = arith.constant 0 : index
    %c0_4 = arith.constant 0 : index
    %3 = vector.load %arg3[%c0_3, %c0_4] : memref<1x128xf32, #tpu.memory_space<vmem>>, vector<1x128xf32>
    %4 = vector.broadcast %3 : vector<1x128xf32> to vector<8x128xf32>
    %5 = arith.addf %2, %4 : vector<8x128xf32>
    %cst_5 = arith.constant 0.000000e+00 : f32
    %6 = vector.broadcast %cst_5 : f32 to vector<8x128xf32>
    %7 = arith.maximumf %5, %6 : vector<8x128xf32>
    %8 = arith.truncf %7 : vector<8x128xf32> to vector<8x128xbf16>
    %c0_6 = arith.constant 0 : index
    %c0_7 = arith.constant 0 : index
    %9 = vector.load %arg4[%c0_6, %c0_7] : memref<128x128xbf16, #tpu.memory_space<vmem>>, vector<128x128xbf16>
    %cst_8 = arith.constant dense<0.000000e+00> : vector<8x128xf32>
    %10 = tpu.matmul %8, %9, %cst_8 {dimension_numbers = #tpu.dot_dimension_numbers<[1], [0], [0], [1], [0, 0, 1, 1], [], []>} : vector<8x128xbf16>, vector<128x128xbf16>, vector<8x128xf32> -> vector<8x128xf32>
    %c0_9 = arith.constant 0 : index
    %c0_10 = arith.constant 0 : index
    %11 = vector.load %arg5[%c0_9, %c0_10] : memref<1x128xf32, #tpu.memory_space<vmem>>, vector<1x128xf32>
    %12 = vector.broadcast %11 : vector<1x128xf32> to vector<8x128xf32>
    %13 = arith.addf %10, %12 : vector<8x128xf32>
    %cst_11 = arith.constant 0.000000e+00 : f32
    %14 = vector.broadcast %cst_11 : f32 to vector<8x128xf32>
    %15 = arith.maximumf %13, %14 : vector<8x128xf32>
    %16 = arith.truncf %15 : vector<8x128xf32> to vector<8x128xbf16>
    %c0_12 = arith.constant 0 : index
    %c0_13 = arith.constant 0 : index
    %17 = vector.load %arg6[%c0_12, %c0_13] : memref<128x128xbf16, #tpu.memory_space<vmem>>, vector<128x128xbf16>
    %cst_14 = arith.constant dense<0.000000e+00> : vector<8x128xf32>
    %18 = tpu.matmul %16, %17, %cst_14 {dimension_numbers = #tpu.dot_dimension_numbers<[1], [0], [0], [1], [0, 0, 1, 1], [], []>} : vector<8x128xbf16>, vector<128x128xbf16>, vector<8x128xf32> -> vector<8x128xf32>
    %c0_15 = arith.constant 0 : index
    %c0_16 = arith.constant 0 : index
    %19 = vector.load %arg7[%c0_15, %c0_16] : memref<1x128xf32, #tpu.memory_space<vmem>>, vector<1x128xf32>
    %20 = vector.broadcast %19 : vector<1x128xf32> to vector<8x128xf32>
    %21 = arith.addf %18, %20 : vector<8x128xf32>
    %22 = vector.extract_strided_slice %21 {offsets = [0, 0], sizes = [8, 4], strides = [1, 1]} : vector<8x128xf32> to vector<8x4xf32>
    %c0_17 = arith.constant 0 : index
    %c0_18 = arith.constant 0 : index
    %23 = vector.load %arg8[%c0_17, %c0_18] : memref<8x4xf32, #tpu.memory_space<vmem>>, vector<8x4xf32>
    tpu.vector_store %arg8[%c0_17, %c0_18], %22 {strides = array<i32>} : memref<8x4xf32, #tpu.memory_space<vmem>>, vector<8x4xf32>,
    return
  }
  func.func @transform_0(%arg0: i32) -> (i32, i32) {
    %c0_i32 = arith.constant 0 : i32
    %c0_i32_0 = arith.constant 0 : i32
    return %arg0, %c0_i32 : i32, i32
  }
  func.func @transform_1(%arg0: i32) -> (i32, i32) {
    %c0_i32 = arith.constant 0 : i32
    %c0_i32_0 = arith.constant 0 : i32
    %c0_i32_1 = arith.constant 0 : i32
    return %c0_i32, %c0_i32_0 : i32, i32
  }
  func.func @transform_2(%arg0: i32) -> (i32, i32) {
    %c0_i32 = arith.constant 0 : i32
    %c0_i32_0 = arith.constant 0 : i32
    %c0_i32_1 = arith.constant 0 : i32
    return %c0_i32, %c0_i32_0 : i32, i32
  }
  func.func @transform_3(%arg0: i32) -> (i32, i32) {
    %c0_i32 = arith.constant 0 : i32
    %c0_i32_0 = arith.constant 0 : i32
    %c0_i32_1 = arith.constant 0 : i32
    return %c0_i32, %c0_i32_0 : i32, i32
  }
  func.func @transform_4(%arg0: i32) -> (i32, i32) {
    %c0_i32 = arith.constant 0 : i32
    %c0_i32_0 = arith.constant 0 : i32
    %c0_i32_1 = arith.constant 0 : i32
    return %c0_i32, %c0_i32_0 : i32, i32
  }
  func.func @transform_5(%arg0: i32) -> (i32, i32) {
    %c0_i32 = arith.constant 0 : i32
    %c0_i32_0 = arith.constant 0 : i32
    %c0_i32_1 = arith.constant 0 : i32
    return %c0_i32, %c0_i32_0 : i32, i32
  }
  func.func @transform_6(%arg0: i32) -> (i32, i32) {
    %c0_i32 = arith.constant 0 : i32
    %c0_i32_0 = arith.constant 0 : i32
    %c0_i32_1 = arith.constant 0 : i32
    return %c0_i32, %c0_i32_0 : i32, i32
  }
  func.func @transform_7(%arg0: i32) -> (i32, i32) {
    %c0_i32 = arith.constant 0 : i32
    %c0_i32_0 = arith.constant 0 : i32
    return %arg0, %c0_i32 : i32, i32
  }
}

</mosaic_0001>

<bundles_post_ra>
// kernel: dq_network_forward.1
= control target key start
LH: loop header
LB: loop body
LE: loop exit
PB: predicated region body
PF: predicated region fallthrough
CT: control target
= control target key end

     0   :  { %12 = vsyncpa [#allocation3], 0  ;;  %s635_s0 = inlined_call_operand.vmem [shape: bf16[8,32], index: 0, kind: input, shape index: {}]   ;;  %s636_s1 = inlined_call_operand.vmem [shape: bf16[32,128], index: 1, kind: input, shape index: {}]   ;;  %s637_s2 = inlined_call_operand.vmem [shape: f32[1,128], index: 2, kind: input, shape index: {}]   ;;  %s638_s3 = inlined_call_operand.hbm [shape: bf16[128,128], index: 3, kind: input, shape index: {}]   ;;  %s639_s4 = inlined_call_operand.vmem [shape: f32[1,128], index: 4, kind: input, shape index: {}]   ;;  %s640_s5 = inlined_call_operand.hbm [shape: bf16[128,128], index: 5, kind: input, shape index: {}]   ;;  %s641_s6 = inlined_call_operand.vmem [shape: f32[1,128], index: 6, kind: input, shape index: {}]   ;;  %s642_s7 = inlined_call_operand.vmem [shape: f32[8,4], index: 7, kind: output, shape index: {}]  }
   0x1   :  { %13 = vsyncpa [#allocation5], 0  ;;  %s520_s24 = smov [#allocation2]   ;;  %s472_s28 = scalar_lea.hbm %s638_s3, 1024 }
   0x2   :  { %s25_s25 = sshll.u32 %s520_s24, 4  ;;  %p473_p0 = scmp.ne.s32.totalorder %s638_s3, %s472_s28  ;;  %s26_s25 = int_to_ptr.vmem [resolvable:$true] %s25_s25 }
   0x3   :  { %p476_p1 = scmp.lt.u32.totalorder %s472_s28, %s638_s3 }
   0x5   :  { %p478_p2 = pnand %p476_p1, %p473_p0 }
   0x7   :  { %481 = shalt.err (!%p478_p2)
}
   0x8   :  { %s482_s10 = scalar_lea.vmem %s26_s25, 1024  ;;  %p487_p4 = scmp.lt.s32.totalorder %s26_s25, %s26_s25 }
   0x9   :  { %p483_p3 = scmp.ne.s32.totalorder %s26_s25, %s482_s10  ;;  %p488_p5 = scmp.lt.s32.totalorder %s482_s10, %s482_s10 }
   0xb   :  { %p489_p6 = por %p488_p5, %p487_p4 }
   0xd   :  { %p490_p7 = pnand %p489_p6, %p483_p3 }
   0xf   :  { %493 = shalt.err (!%p490_p7)
}
  0x10   :  { %s521_s11 = smov 64   ;;  %s522_s12 = smov 4  }
  0x11   :  { %31 = dma.hbm_to_vmem [thread:$0]  %s638_s3, 1024, %s26_s25, [#allocation3], %s521_s11, %s521_s11, %s522_s12  }
  0x12   :  { %s523_s15 = smov [#allocation4]   ;;  %s494_s19 = scalar_lea.hbm %s640_s5, 1024 }
  0x13   :  { %s39_s16 = sshll.u32 %s523_s15, 4  ;;  %p495_p8 = scmp.ne.s32.totalorder %s640_s5, %s494_s19  ;;  %s40_s16 = int_to_ptr.vmem [resolvable:$true] %s39_s16 }
  0x14   :  { %p498_p9 = scmp.lt.u32.totalorder %s494_s19, %s640_s5 }
  0x16   :  { %p500_p10 = pnand %p498_p9, %p495_p8 }
  0x18   :  { %503 = shalt.err (!%p500_p10)
}
  0x19   :  { %s504_s24 = scalar_lea.vmem %s40_s16, 1024  ;;  %p509_p12 = scmp.lt.s32.totalorder %s40_s16, %s40_s16 }
  0x1a   :  { %p505_p11 = scmp.ne.s32.totalorder %s40_s16, %s504_s24  ;;  %p510_p13 = scmp.lt.s32.totalorder %s504_s24, %s504_s24 }
  0x1c   :  { %p511_p0 = por %p510_p13, %p509_p12 }
  0x1e   :  { %p512_p1 = pnand %p511_p0, %p505_p11 }
  0x20   :  { %515 = shalt.err (!%p512_p1)
}
  0x21   :  { %45 = dma.hbm_to_vmem [thread:$0]  %s640_s5, 1024, %s40_s16, [#allocation5], %s521_s11, %s521_s11, %s522_s12  }
  0x22   :  { %516 = dma.done.wait [#allocation3], 1024  }
  0x23   :  { %517 = vsyncadd [#allocation3], 4294966272 }
  0x24   :  { %518 = dma.done.wait [#allocation5], 1024  }
  0x25   :  { %519 = vsyncadd [#allocation5], 4294966272  ;;  %v524_v0 = vmov 0.0   ;;  %vm525_vm0 = vmmov 0   ;;  %v454_v1 = vld [vmem:[%s636_s1] sm:$0xff]   ;;  %v455_v2 = vld [vmem:[%s636_s1 + $0x8] sm:$0xff]  }
  0x26   :  { %400 = vmatprep.subr.bf16.mxu0 %v524_v0  ;;  %404 = vmatprep.mubr.msk.bf16.mxu0 %vm525_vm0, %v524_v0  ;;  %v456_v3 = vld [vmem:[#allocation2] sm:$0xff]   ;;  %vm79_vm1 = vcmask 261120   ;;  %v457_v4 = vld [vmem:[#allocation2 + $0x8] sm:$0xff]   ;;  %v55_v5 = vld [vmem:[%s635_s0] sm:$0xf]  ;;  %vm349_vm2 = vcmask 31744  }
  0x27   :  { %408 = vmatprep.subr.bf16.mxu1 %v524_v0  ;;  %424 = vmatprep.mubr.msk.bf16.mxu1 %vm525_vm0, %v524_v0  ;;  %v458_v6 = vld [vmem:[#allocation2 + $0x10] sm:$0xff]   ;;  %v459_v7 = vld [vmem:[#allocation2 + $0x18] sm:$0xff]   ;;  %v460_v8 = vld [vmem:[#allocation2 + $0x20] sm:$0xff]  }
  0x28   :  { %401 = vmatpush3.bf16.msra.mxu0 %v454_v1  ;;  %409 = vmatpush3.bf16.msra.mxu1 %v456_v3  ;;  %v461_v9 = vld [vmem:[#allocation2 + $0x28] sm:$0xff]   ;;  %v462_v10 = vld [vmem:[#allocation2 + $0x30] sm:$0xff]   ;;  %v463_v11 = vld [vmem:[#allocation2 + $0x38] sm:$0xff]  }
  0x29   :  { %402 = vmatprep.subr.bf16.mxu0 %v524_v0  ;;  %410 = vmatprep.subr.bf16.mxu1 %v524_v0  ;;  %v464_v12 = vld [vmem:[#allocation4] sm:$0xff]   ;;  %v465_v13 = vld [vmem:[#allocation4 + $0x8] sm:$0xff]   ;;  %v466_v14 = vld [vmem:[#allocation4 + $0x10] sm:$0xff]  }
  0x2a   :  { %v467_v15 = vld [vmem:[#allocation4 + $0x18] sm:$0xff]   ;;  %v468_v16 = vld [vmem:[#allocation4 + $0x20] sm:$0xff]   ;;  %v469_v17 = vld [vmem:[#allocation4 + $0x28] sm:$0xff]  }
  0x2b   :  { %v357_v18 = vld [vmem:[%s637_s2] ss:$0 sm:$0xff]  ;;  %v471_v27 = vld [vmem:[#allocation4 + $0x38] sm:$0xff]  }
  0x2c   :  { %403 = vmatpush3.bf16.msra.mxu0 %v455_v2  ;;  %411 = vmatpush3.bf16.msra.mxu1 %v457_v4  ;;  %v470_v26 = vld [vmem:[#allocation4 + $0x30] sm:$0xff]  }
  0x2d   :  { %428 = vmatprep.subr.bf16.mxu0 %v524_v0  ;;  %412 = vmatprep.subr.bf16.mxu1 %v524_v0  ;;  %v361_v28 = vld [vmem:[%s639_s4] ss:$0 sm:$0xff] }
  0x2e   :  { %v370_v36 = vld [vmem:[%s641_s6] ss:$0 sm:$0xff] }
  0x2f   :  { %405 = vmatmul.mubr.msk.bf16.vlgmr.msra.gmra.mrb[0].mxu0 %vm79_vm1, %v55_v5 }
  0x30   :  { %444 = vmatprep.mubr.msk.bf16.mxu0 %vm525_vm0, %v524_v0  ;;  %413 = vmatpush3.bf16.msra.mxu1 %v458_v6 }
  0x31   :  { %414 = vmatprep.subr.bf16.mxu1 %v524_v0  ;;  %429 = vmatpush3.bf16.msra.mxu0 %v464_v12 }
  0x32   :  { %430 = vmatprep.subr.bf16.mxu0 %v524_v0 }
  0x34   :  { %415 = vmatpush3.bf16.msra.mxu1 %v459_v7 }
  0x35   :  { %416 = vmatprep.subr.bf16.mxu1 %v524_v0  ;;  %431 = vmatpush3.bf16.msra.mxu0 %v465_v13 }
  0x36   :  { %432 = vmatprep.subr.bf16.mxu0 %v524_v0 }
  0x38   :  { %417 = vmatpush3.bf16.msra.mxu1 %v460_v8 }
  0x39   :  { %418 = vmatprep.subr.bf16.mxu1 %v524_v0  ;;  %433 = vmatpush3.bf16.msra.mxu0 %v466_v14 }
  0x3a   :  { %434 = vmatprep.subr.bf16.mxu0 %v524_v0 }
  0x3c   :  { %419 = vmatpush3.bf16.msra.mxu1 %v461_v9 }
  0x3d   :  { %420 = vmatprep.subr.bf16.mxu1 %v524_v0  ;;  %435 = vmatpush3.bf16.msra.mxu0 %v467_v15 }
  0x3e   :  { %436 = vmatprep.subr.bf16.mxu0 %v524_v0 }
  0x40   :  { %421 = vmatpush3.bf16.msra.mxu1 %v462_v10 }
  0x41   :  { %422 = vmatprep.subr.bf16.mxu1 %v524_v0  ;;  %437 = vmatpush3.bf16.msra.mxu0 %v468_v16 }
  0x42   :  { %438 = vmatprep.subr.bf16.mxu0 %v524_v0 }
  0x44   :  { %423 = vmatpush3.bf16.msra.mxu1 %v463_v11 }
  0x45   :  { %439 = vmatpush3.bf16.msra.mxu0 %v469_v17 }
  0x46   :  { %440 = vmatprep.subr.bf16.mxu0 %v524_v0 }
  0x49   :  { %441 = vmatpush3.bf16.msra.mxu0 %v470_v26 }
  0x4a   :  { %442 = vmatprep.subr.bf16.mxu0 %v524_v0 }
  0x4d   :  { %443 = vmatpush3.bf16.msra.mxu0 %v471_v27 }
 0x102   :  { %v117_v19 = vpop.f32.mrb[0].mxu0 }
 0x103   :  { %v118_v20 = vadd.f32 %v357_v18, %v117_v19  ;;  %v406_v21 = vpop.f32.mrb[1].mxu0 }
 0x104   :  { %v120_v22 = vpop.f32.mrb[2].mxu0 }
 0x105   :  { %v123_v23 = vmax.f32 %v118_v20, 0.0  ;;  %v407_v24 = vpop.f32.mrb[3].mxu0 }
 0x107   :  { %v124_v25 = vpack.c.bf16 %v123_v23, %v123_v23 }
 0x109   :  { %425 = vmatmul.mubr.bf16.vlgmr.msra.gmra.mrb[0].mxu1 %v124_v25 }
 0x1dc   :  { %v230_v29 = vpop.f32.mrb[0].mxu1 }
 0x1dd   :  { %v231_v30 = vadd.f32 %v361_v28, %v230_v29  ;;  %v426_v31 = vpop.f32.mrb[1].mxu1 }
 0x1de   :  { %v233_v32 = vpop.f32.mrb[2].mxu1 }
 0x1df   :  { %v236_v33 = vmax.f32 %v231_v30, 0.0  ;;  %v427_v34 = vpop.f32.mrb[3].mxu1 }
 0x1e1   :  { %v237_v35 = vpack.c.bf16 %v236_v33, %v236_v33 }
 0x1e3   :  { %445 = vmatmul.mubr.bf16.vlgmr.msra.gmra.mrb[4].mxu0 %v237_v35 }
 0x2b6   :  { %v343_v37 = vpop.f32.mrb[4].mxu0 }
 0x2b7   :  { %v344_v38 = vadd.f32 %v370_v36, %v343_v37  ;;  %v446_v39 = vpop.f32.mrb[5].mxu0 }
 0x2b8   :  { %v346_v40 = vpop.f32.mrb[6].mxu0 }
 0x2b9   :  { %350 = vst.msk [vmem:[%s642_s7] sm:$0xff] %vm349_vm2, %v344_v38  ;;  %v447_v41 = vpop.f32.mrb[7].mxu0 }
 0x2ba   :  { %355 = vsyncpa [#allocation3], 1 }
 0x2bb   :  { %356 = vsyncpa [#allocation5], 1 }

</bundles_post_ra>
